<compile_context>
chip_gen: v5e
topology: v5e:2x2
jax: 0.10.0
libtpu: 0.0.40
codegen_flags: <defaults>
</compile_context>

<pallas_src>
import functools
import numpy as np

import jax
import jax.numpy as jnp
from jax.experimental import pallas as pl
from jax.experimental.pallas import tpu as pltpu

LANE = 128
COMPUTE_DTYPE = jnp.bfloat16        # MXU operand dtype (accumulation stays f32)


def _round_up(x, m):
    return (x + m - 1) // m * m


def _vmem_limit(nbytes):
    # Explicit scoped-VMEM budget with headroom (defaults: 16 MiB v5e / 32 MiB v6e+).
    return int(max(32 * 1024 * 1024, min(2 * nbytes, 128 * 1024 * 1024)))


# ------------------------- GEMM + affine (1x1 convs) -------------------------

def _matmul_affine_kernel(x_ref, w_ref, scale_ref, shift_ref, o_ref, acc_ref, *, relu):
    k = pl.program_id(1)

    @pl.when(k == 0)
    def _():
        acc_ref[...] = jnp.zeros_like(acc_ref)

    acc_ref[...] += jnp.dot(x_ref[...], w_ref[...],
                            preferred_element_type=jnp.float32)

    @pl.when(k == pl.num_programs(1) - 1)
    def _():
        out = acc_ref[...] * scale_ref[...] + shift_ref[...]
        if relu:
            out = jnp.maximum(out, 0.0)
        o_ref[...] = out.astype(o_ref.dtype)


def matmul_affine_pallas(x, w, scale, shift, relu=False):
    """out = (x @ w) * scale + shift (optional ReLU); bf16 MXU operands, f32 accum."""
    M, K = x.shape
    Kw, N = w.shape
    assert K == Kw
    Npad = _round_up(N, LANE)
    if K <= 1024:                       # keep full K resident per block
        TK, Kpad = K, K
    else:                               # K-tiled accumulation
        TK = 512
        Kpad = _round_up(K, TK)
    TM = min(512, _round_up(M, 8))
    Mpad = _round_up(M, TM)

    x_p = jnp.pad(x.astype(COMPUTE_DTYPE), ((0, Mpad - M), (0, Kpad - K)))
    w_p = jnp.pad(w.astype(COMPUTE_DTYPE), ((0, Kpad - K), (0, Npad - N)))
    scale_p = jnp.pad(scale.astype(jnp.float32).reshape(1, N), ((0, 0), (0, Npad - N)))
    shift_p = jnp.pad(shift.astype(jnp.float32).reshape(1, N), ((0, 0), (0, Npad - N)))

    n_m, n_k = Mpad // TM, Kpad // TK
    need = (2 * (TM * TK + TK * Npad) * 2        # double-buffered bf16 tiles
            + 2 * 2 * Npad * 4                   # scale / shift
            + 3 * TM * Npad * 4)                 # out (x2 buffers) + accumulator

    out = pl.pallas_call(
        functools.partial(_matmul_affine_kernel, relu=relu),
        out_shape=jax.ShapeDtypeStruct((Mpad, Npad), jnp.float32),
        grid_spec=pltpu.PrefetchScalarGridSpec(
            num_scalar_prefetch=0,
            grid=(n_m, n_k),
            in_specs=[
                pl.BlockSpec((TM, TK), lambda i, k: (i, k)),
                pl.BlockSpec((TK, Npad), lambda i, k: (k, 0)),
                pl.BlockSpec((1, Npad), lambda i, k: (0, 0)),
                pl.BlockSpec((1, Npad), lambda i, k: (0, 0)),
            ],
            out_specs=pl.BlockSpec((TM, Npad), lambda i, k: (i, 0)),
            scratch_shapes=[pltpu.VMEM((TM, Npad), jnp.float32)],
        ),
        compiler_params=pltpu.CompilerParams(
            dimension_semantics=("parallel", "arbitrary"),
            vmem_limit_bytes=_vmem_limit(need)),
    )(x_p, w_p, scale_p, shift_p)
    return out[:M, :N]


def matmul_affine_ref(x, w, scale, shift, relu=False):
    out = jnp.dot(x.astype(jnp.float32), w.astype(jnp.float32),
                  preferred_element_type=jnp.float32)
    out = out * scale.reshape(1, -1) + shift.reshape(1, -1)
    return jnp.maximum(out, 0.0) if relu else out


# --------------------- grouped 3x3 conv (smooth / fusion) --------------------

def _make_conv3x3_kernel(group_channels, group_sizes, H, W, Npad, relu):
    n_groups = len(group_channels)
    n_inputs = int(sum(group_sizes))

    def kernel(*refs):
        x_refs = refs[:n_inputs]
        w_refs = refs[n_inputs:n_inputs + n_groups]
        scale_ref = refs[n_inputs + n_groups]
        shift_ref = refs[n_inputs + n_groups + 1]
        o_ref = refs[n_inputs + n_groups + 2]
        acc_ref = refs[n_inputs + n_groups + 3]
        pad_refs = refs[n_inputs + n_groups + 4:]

        acc_ref[...] = jnp.zeros_like(acc_ref)
        xi = 0
        for g in range(n_groups):
            cg = group_channels[g]
            pr = pad_refs[g]
            # Zero-padded (pad=1) activation tile built in VMEM only: no im2col
            # and no padded/concatenated copy ever hits HBM.
            pr[...] = jnp.zeros_like(pr)
            interior = x_refs[xi][0].astype(jnp.float32)
            xi += 1
            for _ in range(1, group_sizes[g]):            # fused up_and_add
                interior = interior + x_refs[xi][0].astype(jnp.float32)
                xi += 1
            pr[pl.ds(1, H), pl.ds(1, W), :] = interior
            wg = w_refs[g]
            for kh in range(3):
                for kw in range(3):
                    patch = pr[pl.ds(kh, H), pl.ds(kw, W), :]
                    patch = patch.reshape(H * W, cg).astype(COMPUTE_DTYPE)
                    wk = wg[pl.ds((kh * 3 + kw) * cg, cg), :]
                    acc_ref[...] += jnp.dot(patch, wk,
                                            preferred_element_type=jnp.float32)
        out = acc_ref[...] * scale_ref[...] + shift_ref[...]
        if relu:
            out = jnp.maximum(out, 0.0)
        o_ref[0] = out.astype(o_ref.dtype)

    return kernel


def conv3x3_groups_pallas(groups, weights_hwio, scale, shift, relu=False):
    """sum_g conv3x3(sum(groups[g]), weights_hwio[g]), padding=1, affine (+ReLU).

    `groups` is a list of lists of NHWC tensors; tensors inside one group are
    summed before the conv (fused up_and_add) and each group has its own HWIO
    weight slice (replaces the channel concat in front of conv_fusion).
    """
    B, H, W, _ = groups[0][0].shape
    Cout = int(weights_hwio[0].shape[-1])
    Npad = _round_up(Cout, LANE)
    # Round spatial dims up to multiples of 8 with zero rows/cols: exact for a
    # zero-padded 3x3 conv, keeps sublane-aligned layouts in VMEM.
    Hp, Wp = _round_up(H, 8), _round_up(W, 8)
    group_channels = [int(w.shape[2]) for w in weights_hwio]
    group_sizes = [len(g) for g in groups]
    n_groups = len(groups)

    flat_inputs, in_specs = [], []
    for g, grp in enumerate(groups):
        cg = group_channels[g]
        for t in grp:
            t = t.astype(COMPUTE_DTYPE)
            if (Hp, Wp) != (H, W):
                t = jnp.pad(t, ((0, 0), (0, Hp - H), (0, Wp - W), (0, 0)))
            flat_inputs.append(t)
            in_specs.append(pl.BlockSpec((1, Hp, Wp, cg), lambda b: (b, 0, 0, 0)))
    w_inputs = []
    for wg in weights_hwio:
        cg = int(wg.shape[2])
        wmat = wg.reshape(9 * cg, Cout).astype(COMPUTE_DTYPE)
        w_inputs.append(jnp.pad(wmat, ((0, 0), (0, Npad - Cout))))
        in_specs.append(pl.BlockSpec((9 * cg, Npad), lambda b: (0, 0)))
    scale_p = jnp.pad(scale.astype(jnp.float32).reshape(1, Cout),
                      ((0, 0), (0, Npad - Cout)))
    shift_p = jnp.pad(shift.astype(jnp.float32).reshape(1, Cout),
                      ((0, 0), (0, Npad - Cout)))
    in_specs += [pl.BlockSpec((1, Npad), lambda b: (0, 0)),
                 pl.BlockSpec((1, Npad), lambda b: (0, 0))]

    scratch_shapes = (
        [pltpu.VMEM((Hp * Wp, Npad), jnp.float32)] +
        [pltpu.VMEM((Hp + 2, Wp + 2, cg), jnp.float32) for cg in group_channels])

    in_bytes = sum(len(grp) * Hp * Wp * group_channels[g] * 2
                   for g, grp in enumerate(groups))
    in_bytes += sum(9 * c * Npad * 2 for c in group_channels) + 2 * Npad * 4
    out_bytes = Hp * Wp * Npad * 4
    scr_bytes = Hp * Wp * Npad * 4 + sum((Hp + 2) * (Wp + 2) * c * 4
                                         for c in group_channels)
    need = 2 * in_bytes + 2 * out_bytes + scr_bytes

    kernel = _make_conv3x3_kernel(tuple(group_channels), tuple(group_sizes),
                                  Hp, Wp, Npad, relu)
    out = pl.pallas_call(
        kernel,
        out_shape=jax.ShapeDtypeStruct((B, Hp * Wp, Npad), jnp.float32),
        grid_spec=pltpu.PrefetchScalarGridSpec(
            num_scalar_prefetch=0,
            grid=(B,),
            in_specs=in_specs,
            out_specs=pl.BlockSpec((1, Hp * Wp, Npad), lambda b: (b, 0, 0)),
            scratch_shapes=scratch_shapes),
        compiler_params=pltpu.CompilerParams(
            dimension_semantics=("parallel",),
            vmem_limit_bytes=_vmem_limit(need)),
    )(*flat_inputs, *w_inputs, scale_p, shift_p)
    return out.reshape(B, Hp, Wp, Npad)[:, :H, :W, :Cout]


def conv3x3_groups_ref(groups, weights_hwio, scale, shift, relu=False):
    acc = None
    for grp, wg in zip(groups, weights_hwio):
        x = grp[0].astype(jnp.float32)
        for t in grp[1:]:
            x = x + t.astype(jnp.float32)
        y = jax.lax.conv_general_dilated(
            x, wg.astype(jnp.float32), window_strides=(1, 1), padding='SAME',
            dimension_numbers=('NHWC', 'HWIO', 'NHWC'))
        acc = y if acc is None else acc + y
    out = acc * scale.reshape(1, 1, 1, -1) + shift.reshape(1, 1, 1, -1)
    return jnp.maximum(out, 0.0) if relu else out


# --------------------------- conv / upsample glue ----------------------------

def conv1x1_nhwc(x, w, b, mm):
    B, H, W, C = x.shape
    Cout = w.shape[1]
    y = mm(x.reshape(B * H * W, C), w, jnp.ones((Cout,), jnp.float32), b)
    return y.reshape(B, H, W, Cout)


def _interp_matrix(out_size, in_size):
    """Row-stochastic matrix reproducing F.interpolate(..., align_corners=True)."""
    A = np.zeros((out_size, in_size), np.float32)
    if in_size == 1:
        A[:, 0] = 1.0
        return jnp.asarray(A)
    if out_size == 1:
        src = np.zeros((1,), np.float64)
    else:
        src = np.arange(out_size, dtype=np.float64) * (in_size - 1) / (out_size - 1)
    lo = np.clip(np.floor(src).astype(np.int64), 0, in_size - 2)
    frac = (src - lo).astype(np.float32)
    A[np.arange(out_size), lo] = 1.0 - frac
    A[np.arange(out_size), lo + 1] = frac
    return jnp.asarray(A)


def upsample_bilinear_ac_nhwc(x, H_out, W_out):
    # bilinear, align_corners=True; kept as XLA glue (the conv/GEMM hot paths
    # run in the Pallas kernels).
    B, H, W, C = x.shape
    if (H_out, W_out) == (H, W):
        return x
    Ah = _interp_matrix(H_out, H)
    Aw = _interp_matrix(W_out, W)
    return jnp.einsum('hp,bpqc,wq->bhwc', Ah, x, Aw)


# ------------------------------- FPN_fuse ------------------------------------

def init_params(key, feature_channels, fpn_out):
    assert feature_channels[0] == fpn_out
    ks = jax.random.split(key, 13)
    params = {'conv1x1_w': [], 'conv1x1_b': []}
    # lateral 1x1 convs: PyTorch weight (Cout, Cin, 1, 1) -> stored as (Cin, Cout)
    for i, cin in enumerate(feature_channels[1:]):
        w = 0.1 * jax.random.normal(ks[i], (fpn_out, cin, 1, 1), jnp.float32)
        params['conv1x1_w'].append(jnp.transpose(w[:, :, 0, 0], (1, 0)))
        params['conv1x1_b'].append(
            0.1 * jax.random.normal(ks[3 + i], (fpn_out,), jnp.float32))
    # shared smooth 3x3 conv: (Cout, Cin, 3, 3) -> (3, 3, Cin, Cout)
    w = 0.1 * jax.random.normal(ks[6], (fpn_out, fpn_out, 3, 3), jnp.float32)
    params['smooth_w'] = jnp.transpose(w, (2, 3, 1, 0))
    params['smooth_b'] = 0.1 * jax.random.normal(ks[7], (fpn_out,), jnp.float32)
    # fusion 3x3 conv (bias=False): (Cout, 4*fpn_out, 3, 3) -> (3, 3, 4*fpn_out, Cout)
    cin = len(feature_channels) * fpn_out
    w = 0.1 * jax.random.normal(ks[8], (fpn_out, cin, 3, 3), jnp.float32)
    params['fusion_w'] = jnp.transpose(w, (2, 3, 1, 0))
    # BatchNorm2d (eval mode) folded into an affine scale/shift epilogue.
    gamma = 1.0 + 0.1 * jax.random.normal(ks[9], (fpn_out,), jnp.float32)
    beta = 0.1 * jax.random.normal(ks[10], (fpn_out,), jnp.float32)
    mean = 0.1 * jax.random.normal(ks[11], (fpn_out,), jnp.float32)
    var = jnp.abs(0.5 + 0.1 * jax.random.normal(ks[12], (fpn_out,), jnp.float32))
    eps = 1e-5
    bn_scale = gamma / jnp.sqrt(var + eps)
    params['bn_scale'] = bn_scale
    params['bn_shift'] = beta - mean * bn_scale
    return params


def fpn_fuse_forward(features_nchw, params, use_pallas=True):
    mm = matmul_affine_pallas if use_pallas else matmul_affine_ref
    conv3 = conv3x3_groups_pallas if use_pallas else conv3x3_groups_ref
    # NCHW -> NHWC
    feats = [jnp.transpose(f, (0, 2, 3, 1)).astype(jnp.float32)
             for f in features_nchw]
    fpn_out = params['smooth_w'].shape[-1]
    ones = jnp.ones((fpn_out,), jnp.float32)

    # features[1:] = [conv1x1(feature) ...]
    feats = [feats[0]] + [
        conv1x1_nhwc(f, params['conv1x1_w'][i], params['conv1x1_b'][i], mm)
        for i, f in enumerate(feats[1:])
    ]

    # up_and_add + shared smooth conv; the elementwise add is fused into the
    # smooth-conv kernel (the two operands are summed inside the kernel).
    n = len(feats)
    P = []
    for i in reversed(range(1, n)):
        tgt = feats[i - 1]
        up = upsample_bilinear_ac_nhwc(feats[i], tgt.shape[1], tgt.shape[2])
        P.append(conv3([[up, tgt]], [params['smooth_w']], ones,
                       params['smooth_b'], relu=False))
    P = list(reversed(P))
    P.append(feats[-1])

    H, W = P[0].shape[1], P[0].shape[2]
    P = [P[0]] + [upsample_bilinear_ac_nhwc(p, H, W) for p in P[1:]]

    # conv_fusion (3x3, no bias) + folded BN + ReLU.  No channel concat: the
    # fusion weight is split into per-branch groups accumulated in-kernel.
    n_groups = len(P)
    w_groups = [params['fusion_w'][:, :, g * fpn_out:(g + 1) * fpn_out, :]
                for g in range(n_groups)]
    out = conv3([[p] for p in P], w_groups, params['bn_scale'],
                params['bn_shift'], relu=True)
    return jnp.transpose(out, (0, 3, 1, 2))            # back to NCHW


# ---------------------------------- main --------------------------------------

if __name__ == "__main__":
    key = jax.random.PRNGKey(0)
    feature_channels = [8, 16, 32, 64]   # small analogue of [256, 512, 1024, 2048]
    fpn_out = 8
    B = 2
    spatial = [16, 8, 4, 2]

    kf = jax.random.split(key, len(feature_channels) + 1)
    features = [
        jax.random.normal(kf[i], (B, c, s, s), jnp.float32)
        for i, (c, s) in enumerate(zip(feature_channels, spatial))
    ]
    params = init_params(kf[-1], feature_channels, fpn_out)

    out = jax.block_until_ready(fpn_fuse_forward(features, params, use_pallas=True))
    ref = jax.block_until_ready(fpn_fuse_forward(features, params, use_pallas=False))

    assert out.shape == (B, fpn_out, spatial[0], spatial[0]), out.shape
    max_err = float(jnp.max(jnp.abs(out - ref)))
    rel_err = float(jnp.linalg.norm(out - ref) / (jnp.linalg.norm(ref) + 1e-6))
    # bf16 MXU operands (f32 accumulation) vs. the f32 XLA reference.
    assert max_err < 0.15 and rel_err < 0.05, (max_err, rel_err)

    print("KERNEL_OK")
</pallas_src>

<mosaic_0001>
module attributes {stable_mosaic.version = 11 : i64} {
  func.func @_matmul_affine_kernel(%arg0: i32, %arg1: i32, %arg2: memref<128x16xbf16, #tpu.memory_space<vmem>>, %arg3: memref<16x128xbf16, #tpu.memory_space<vmem>>, %arg4: memref<1x128xf32, #tpu.memory_space<vmem>>, %arg5: memref<1x128xf32, #tpu.memory_space<vmem>>, %arg6: memref<128x128xf32, #tpu.memory_space<vmem>>, %arg7: memref<128x128xf32, #tpu.memory_space<vmem>>) attributes {dimension_semantics = [#tpu.dimension_semantics<parallel>, #tpu.dimension_semantics<arbitrary>], iteration_bounds = array<i64: 1, 1>, scalar_prefetch = 0 : i64, scratch_operands = 1 : i64, tpu.core_type = #tpu.core_type<tc>, window_params = [{transform_indices = @transform_0, window_bounds = array<i64: 128, 16>}, {transform_indices = @transform_1, window_bounds = array<i64: 16, 128>}, {pipeline_mode = #tpu.pipeline_mode<synchronous>, transform_indices = @transform_2, window_bounds = array<i64: 1, 128>}, {pipeline_mode = #tpu.pipeline_mode<synchronous>, transform_indices = @transform_3, window_bounds = array<i64: 1, 128>}, {transform_indices = @transform_4, window_bounds = array<i64: 128, 128>}]} {
    %c0_i32 = arith.constant 0 : i32
    %0 = arith.cmpi eq, %arg1, %c0_i32 : i32
    %1 = arith.extui %0 : i1 to i32
    %c0_i32_0 = arith.constant 0 : i32
    %2 = arith.cmpi ne, %1, %c0_i32_0 : i32
    scf.if %2 {
      %cst_10 = arith.constant 0.000000e+00 : f32
      %12 = vector.broadcast %cst_10 : f32 to vector<128x128xf32>
      %c0_11 = arith.constant 0 : index
      %c0_12 = arith.constant 0 : index
      %13 = vector.load %arg7[%c0_11, %c0_12] : memref<128x128xf32, #tpu.memory_space<vmem>>, vector<128x128xf32>
      tpu.vector_store %arg7[%c0_11, %c0_12], %12 {strides = array<i32>} : memref<128x128xf32, #tpu.memory_space<vmem>>, vector<128x128xf32>,
    } else {
    }
    %c0 = arith.constant 0 : index
    %c0_1 = arith.constant 0 : index
    %3 = vector.load %arg7[%c0, %c0_1] : memref<128x128xf32, #tpu.memory_space<vmem>>, vector<128x128xf32>
    %c0_2 = arith.constant 0 : index
    %c0_3 = arith.constant 0 : index
    %4 = vector.load %arg2[%c0_2, %c0_3] : memref<128x16xbf16, #tpu.memory_space<vmem>>, vector<128x16xbf16>
    %c0_4 = arith.constant 0 : index
    %c0_5 = arith.constant 0 : index
    %5 = vector.load %arg3[%c0_4, %c0_5] : memref<16x128xbf16, #tpu.memory_space<vmem>>, vector<16x128xbf16>
    %cst = arith.constant dense<0.000000e+00> : vector<128x128xf32>
    %6 = tpu.matmul %4, %5, %cst {dimension_numbers = #tpu.dot_dimension_numbers<[1], [0], [0], [1], [0, 0, 1, 1], [], []>} : vector<128x16xbf16>, vector<16x128xbf16>, vector<128x128xf32> -> vector<128x128xf32>
    %7 = arith.addf %3, %6 : vector<128x128xf32>
    %c0_6 = arith.constant 0 : index
    %c0_7 = arith.constant 0 : index
    %8 = vector.load %arg7[%c0_6, %c0_7] : memref<128x128xf32, #tpu.memory_space<vmem>>, vector<128x128xf32>
    tpu.vector_store %arg7[%c0_6, %c0_7], %7 {strides = array<i32>} : memref<128x128xf32, #tpu.memory_space<vmem>>, vector<128x128xf32>,
    %c0_i32_8 = arith.constant 0 : i32
    %9 = arith.cmpi eq, %arg1, %c0_i32_8 : i32
    %10 = arith.extui %9 : i1 to i32
    %c0_i32_9 = arith.constant 0 : i32
    %11 = arith.cmpi ne, %10, %c0_i32_9 : i32
    scf.if %11 {
      %c0_10 = arith.constant 0 : index
      %c0_11 = arith.constant 0 : index
      %12 = vector.load %arg7[%c0_10, %c0_11] : memref<128x128xf32, #tpu.memory_space<vmem>>, vector<128x128xf32>
      %c0_12 = arith.constant 0 : index
      %c0_13 = arith.constant 0 : index
      %13 = vector.load %arg4[%c0_12, %c0_13] : memref<1x128xf32, #tpu.memory_space<vmem>>, vector<1x128xf32>
      %14 = vector.broadcast %13 : vector<1x128xf32> to vector<128x128xf32>
      %15 = arith.mulf %12, %14 : vector<128x128xf32>
      %c0_14 = arith.constant 0 : index
      %c0_15 = arith.constant 0 : index
      %16 = vector.load %arg5[%c0_14, %c0_15] : memref<1x128xf32, #tpu.memory_space<vmem>>, vector<1x128xf32>
      %17 = vector.broadcast %16 : vector<1x128xf32> to vector<128x128xf32>
      %18 = arith.addf %15, %17 : vector<128x128xf32>
      %c0_16 = arith.constant 0 : index
      %c0_17 = arith.constant 0 : index
      %19 = vector.load %arg6[%c0_16, %c0_17] : memref<128x128xf32, #tpu.memory_space<vmem>>, vector<128x128xf32>
      tpu.vector_store %arg6[%c0_16, %c0_17], %18 {strides = array<i32>} : memref<128x128xf32, #tpu.memory_space<vmem>>, vector<128x128xf32>,
    } else {
    }
    return
  }
  func.func @transform_0(%arg0: i32, %arg1: i32) -> (i32, i32) {
    %c0_i32 = arith.constant 0 : i32
    return %arg0, %arg1 : i32, i32
  }
  func.func @transform_1(%arg0: i32, %arg1: i32) -> (i32, i32) {
    %c0_i32 = arith.constant 0 : i32
    %c0_i32_0 = arith.constant 0 : i32
    return %arg1, %c0_i32 : i32, i32
  }
  func.func @transform_2(%arg0: i32, %arg1: i32) -> (i32, i32) {
    %c0_i32 = arith.constant 0 : i32
    %c0_i32_0 = arith.constant 0 : i32
    %c0_i32_1 = arith.constant 0 : i32
    return %c0_i32, %c0_i32_0 : i32, i32
  }
  func.func @transform_3(%arg0: i32, %arg1: i32) -> (i32, i32) {
    %c0_i32 = arith.constant 0 : i32
    %c0_i32_0 = arith.constant 0 : i32
    %c0_i32_1 = arith.constant 0 : i32
    return %c0_i32, %c0_i32_0 : i32, i32
  }
  func.func @transform_4(%arg0: i32, %arg1: i32) -> (i32, i32) {
    %c0_i32 = arith.constant 0 : i32
    %c0_i32_0 = arith.constant 0 : i32
    return %arg0, %c0_i32 : i32, i32
  }
}

</mosaic_0001>

<bundles_post_ra>
// kernel: tpu_custom_call.1
= control target key start
LH: loop header
LB: loop body
LE: loop exit
PB: predicated region body
PF: predicated region fallthrough
CT: control target
= control target key end

     0   :  { %vm119_vm0 = vcmask 130048   ;;  %s513_s0 = inlined_call_operand.vmem [shape: bf16[128,16], index: 0, kind: input, shape index: {}]   ;;  %s514_s1 = inlined_call_operand.vmem [shape: bf16[16,128], index: 1, kind: input, shape index: {}]   ;;  %s515_s2 = inlined_call_operand.vmem [shape: f32[1,128], index: 2, kind: input, shape index: {}]   ;;  %s516_s3 = inlined_call_operand.vmem [shape: f32[1,128], index: 3, kind: input, shape index: {}]   ;;  %s517_s4 = inlined_call_operand.hbm [shape: f32[128,128], index: 4, kind: output, shape index: {}]  }
   0x1   :  { %v370_v0 = vld [vmem:[%s514_s1] sm:$0xff]  ;;  %v364_v2 = vld [vmem:[%s513_s0 + $0x10] sm:$0xff] }
   0x2   :  { %v362_v1 = vld [vmem:[%s513_s0] sm:$0xff]  ;;  %151 = vmatpush.bf16.msra.mxu0 %v370_v0  ;;  %371 = vmatpush.bf16.msra.mxu1 %v370_v0  ;;  %v368_v4 = vld [vmem:[%s513_s0 + $0x30] sm:$0xff] }
   0x3   :  { %v366_v3 = vld [vmem:[%s513_s0 + $0x20] sm:$0xff]  ;;  %372 = vmatpush.bf16.msra.mxu2 %v370_v0  ;;  %373 = vmatpush.bf16.msra.mxu3 %v370_v0 }
   0x4   :  { %9 = vsyncpa [#allocation4], 0  ;;  %v363_v5 = vld [vmem:[%s513_s0 + $0x8] sm:$0xff]  ;;  %v365_v6 = vld [vmem:[%s513_s0 + $0x18] sm:$0xff]  ;;  %s306_s11 = sshll.u32 %s517_s4, 4  ;;  %s406_s12 = smov 128   ;;  %s307_s11 = int_to_ptr.hbm [resolvable:$true] %s306_s11 }
   0x5   :  { %354 = vmatmul.msk.bf16.vlgmr.msra.gmra.mxu0 %vm119_vm0, %v362_v1  ;;  %356 = vmatmul.msk.bf16.vlgmr.msra.gmra.mxu1 %vm119_vm0, %v364_v2  ;;  %v367_v7 = vld [vmem:[%s513_s0 + $0x28] sm:$0xff]  ;;  %v369_v8 = vld [vmem:[%s513_s0 + $0x38] sm:$0xff]  ;;  %v471_v9 = vld [vmem:[%s515_s2] ss:$0 sm:$0xff]  ;;  %s405_s0 = smov [#allocation3]   ;;  %s407_s13 = smov 8  }
   0x6   :  { %358 = vmatmul.msk.bf16.vlgmr.msra.gmra.mxu2 %vm119_vm0, %v366_v3  ;;  %360 = vmatmul.msk.bf16.vlgmr.msra.gmra.mxu3 %vm119_vm0, %v368_v4  ;;  %v476_v10 = vld [vmem:[%s516_s3] ss:$0 sm:$0xff]  ;;  %s304_s2 = sshll.u32 %s405_s0, 4  ;;  %s305_s2 = int_to_ptr.vmem [resolvable:$true] %s304_s2 }
  0x15   :  { %355 = vmatmul.msk.bf16.gmra.mxu0 %vm119_vm0, %v363_v5  ;;  %357 = vmatmul.msk.bf16.gmra.mxu1 %vm119_vm0, %v365_v6 }
  0x16   :  { %359 = vmatmul.msk.bf16.gmra.mxu2 %vm119_vm0, %v367_v7  ;;  %361 = vmatmul.msk.bf16.gmra.mxu3 %vm119_vm0, %v369_v8 }
  0x82   :  { %v153_v11 = vpop.f32.mrf.mxu0  ;;  %v163_v12 = vpop.f32.mrf.mxu1 }
  0x83   :  { %v248_v13 = vmul.f32 %v471_v9, %v153_v11  ;;  %v252_v14 = vmul.f32 %v471_v9, %v163_v12 }
  0x85   :  { %v268_v15 = vadd.f32 %v476_v10, %v248_v13  ;;  %v272_v16 = vadd.f32 %v476_v10, %v252_v14 }
  0x87   :  { %284 = vst [vmem:[#allocation3] sm:$0xff] %v268_v15 }
  0x88   :  { %288 = vst [vmem:[#allocation3 + $0x20] sm:$0xff] %v272_v16 }
  0x89   :  { %v173_v17 = vpop.f32.mrf.mxu2  ;;  %v183_v18 = vpop.f32.mrf.mxu3 }
  0x8a   :  { %v256_v19 = vmul.f32 %v471_v9, %v173_v17  ;;  %v260_v20 = vmul.f32 %v471_v9, %v183_v18  ;;  %v155_v21 = vpop.f32.mrf.mxu0  ;;  %v165_v22 = vpop.f32.mrf.mxu1 }
  0x8b   :  { %v249_v23 = vmul.f32 %v471_v9, %v155_v21  ;;  %v253_v24 = vmul.f32 %v471_v9, %v165_v22 }
  0x8c   :  { %v276_v25 = vadd.f32 %v476_v10, %v256_v19  ;;  %v280_v26 = vadd.f32 %v476_v10, %v260_v20 }
  0x8d   :  { %v269_v27 = vadd.f32 %v476_v10, %v249_v23  ;;  %v273_v28 = vadd.f32 %v476_v10, %v253_v24 }
  0x8e   :  { %292 = vst [vmem:[#allocation3 + $0x40] sm:$0xff] %v276_v25 }
  0x8f   :  { %296 = vst [vmem:[#allocation3 + $0x60] sm:$0xff] %v280_v26 }
  0x90   :  { %285 = vst [vmem:[#allocation3 + $0x8] sm:$0xff] %v269_v27 }
  0x91   :  { %289 = vst [vmem:[#allocation3 + $0x28] sm:$0xff] %v273_v28  ;;  %v175_v29 = vpop.f32.mrf.mxu2  ;;  %v185_v30 = vpop.f32.mrf.mxu3 }
  0x92   :  { %v257_v31 = vmul.f32 %v471_v9, %v175_v29  ;;  %v261_v32 = vmul.f32 %v471_v9, %v185_v30  ;;  %v158_v33 = vpop.f32.mrf.mxu0  ;;  %v168_v34 = vpop.f32.mrf.mxu1 }
  0x93   :  { %v250_v35 = vmul.f32 %v471_v9, %v158_v33  ;;  %v254_v36 = vmul.f32 %v471_v9, %v168_v34 }
  0x94   :  { %v277_v37 = vadd.f32 %v476_v10, %v257_v31  ;;  %v281_v38 = vadd.f32 %v476_v10, %v261_v32 }
  0x95   :  { %v270_v39 = vadd.f32 %v476_v10, %v250_v35  ;;  %v274_v40 = vadd.f32 %v476_v10, %v254_v36 }
  0x96   :  { %293 = vst [vmem:[#allocation3 + $0x48] sm:$0xff] %v277_v37 }
  0x97   :  { %297 = vst [vmem:[#allocation3 + $0x68] sm:$0xff] %v281_v38 }
  0x98   :  { %286 = vst [vmem:[#allocation3 + $0x10] sm:$0xff] %v270_v39 }
  0x99   :  { %290 = vst [vmem:[#allocation3 + $0x30] sm:$0xff] %v274_v40  ;;  %v178_v41 = vpop.f32.mrf.mxu2  ;;  %v188_v42 = vpop.f32.mrf.mxu3 }
  0x9a   :  { %v258_v43 = vmul.f32 %v471_v9, %v178_v41  ;;  %v262_v44 = vmul.f32 %v471_v9, %v188_v42  ;;  %v160_v45 = vpop.f32.mrf.mxu0  ;;  %v170_v46 = vpop.f32.mrf.mxu1 }
  0x9b   :  { %v251_v47 = vmul.f32 %v471_v9, %v160_v45  ;;  %v255_v48 = vmul.f32 %v471_v9, %v170_v46 }
  0x9c   :  { %v278_v49 = vadd.f32 %v476_v10, %v258_v43  ;;  %v282_v50 = vadd.f32 %v476_v10, %v262_v44 }
  0x9d   :  { %v271_v51 = vadd.f32 %v476_v10, %v251_v47  ;;  %v275_v52 = vadd.f32 %v476_v10, %v255_v48 }
  0x9e   :  { %294 = vst [vmem:[#allocation3 + $0x50] sm:$0xff] %v278_v49 }
  0x9f   :  { %298 = vst [vmem:[#allocation3 + $0x70] sm:$0xff] %v282_v50 }
  0xa0   :  { %287 = vst [vmem:[#allocation3 + $0x18] sm:$0xff] %v271_v51 }
  0xa1   :  { %291 = vst [vmem:[#allocation3 + $0x38] sm:$0xff] %v275_v52  ;;  %v180_v53 = vpop.f32.mrf.mxu2  ;;  %v190_v54 = vpop.f32.mrf.mxu3 }
  0xa2   :  { %v259_v55 = vmul.f32 %v471_v9, %v180_v53  ;;  %v263_v56 = vmul.f32 %v471_v9, %v190_v54 }
  0xa4   :  { %v279_v57 = vadd.f32 %v476_v10, %v259_v55  ;;  %v283_v58 = vadd.f32 %v476_v10, %v263_v56 }
  0xa6   :  { %295 = vst [vmem:[#allocation3 + $0x58] sm:$0xff] %v279_v57 }
  0xa7   :  { %299 = vst [vmem:[#allocation3 + $0x78] sm:$0xff] %v283_v58 }
  0xa8   :  { %312 = dma.vmem_to_hbm [thread:$0]  %s305_s2, 2048, %s307_s11, [#allocation4], %s406_s12, %s406_s12, %s407_s13  }
  0xa9   :  { %403 = dma.done.wait [#allocation4], 2048  }
  0xaa   :  { %404 = vsyncadd [#allocation4], 4294965248 }
  0xab   :  { %317 = vsyncpa [#allocation4], 1 }

</bundles_post_ra>
